<compile_context>
chip_gen: v7x
topology: tpu7x:2x2x1
jax: 0.10.0
libtpu: 0.0.40
codegen_flags: <defaults>
</compile_context>

<pallas_src>
import jax
import jax.numpy as jnp
from jax.experimental import pallas as pl
from jax.experimental.pallas import tpu as pltpu


def calculate_laplacian_with_self_loop(adj: jnp.ndarray) -> jnp.ndarray:
    """D^{-1/2} (A + I) D^{-1/2}, same as the PyTorch helper."""
    n = adj.shape[0]
    m = adj + jnp.eye(n, dtype=adj.dtype)
    row_sum = m.sum(axis=1)
    d_inv_sqrt = jnp.power(row_sum, -0.5)
    d_inv_sqrt = jnp.where(jnp.isinf(d_inv_sqrt), 0.0, d_inv_sqrt)
    d_mat = jnp.diag(d_inv_sqrt)
    return (m @ d_mat).T @ d_mat


def _tgcn_kernel(lap_ref, x_ref, w_ref, b_ref, out_ref):
    # lap_ref: (N, N)        f32   normalized laplacian
    # x_ref:   (N, B*F)      f32   node-major activations, batch folded into lanes
    # w_ref:   (B*F, B*D)    f32   block-diagonal weights: kron(I_B, W)
    # b_ref:   (1, B*D)      f32   bias tiled across the batch
    # out_ref: (N, B*D)      f32
    #
    # Two MXU dots for the whole batch; bias broadcast happens exactly once.
    xw = jnp.dot(x_ref[...], w_ref[...], preferred_element_type=jnp.float32)
    out_ref[...] = (
        jnp.dot(lap_ref[...], xw, preferred_element_type=jnp.float32) + b_ref[...]
    )


def tgcn_graph_convolution(inputs, hidden_state, laplacian, weights, biases,
                           num_gru_units, output_dim):
    """
    inputs:       (B, N, C)           float32
    hidden_state: (B, N * G)          float32
    laplacian:    (N, N)              float32
    weights:      (G + C, D)          float32
    biases:       (D,)                float32
    returns:      (B, N * D)          float32
    """
    batch_size, num_nodes, c = inputs.shape
    g = num_gru_units
    d = output_dim
    f = g + c

    # Wrapper-side layout plumbing (all tiny; done once by XLA outside the kernel):
    hidden3d = hidden_state.reshape((batch_size, num_nodes, g))
    concat = jnp.concatenate([inputs, hidden3d], axis=-1)                 # (B, N, F)
    # Node-major rows, batch folded into lanes: x_nm[n, b*F + f] = concat[b, n, f]
    x_nm = concat.transpose(1, 0, 2).reshape((num_nodes, batch_size * f))  # (N, B*F)
    # Block-diagonal weight expansion so the per-batch feature matmul is ONE dot:
    #   w_bd[b*F + f, b*D + d] = W[f, d]
    w_bd = jnp.kron(jnp.eye(batch_size, dtype=weights.dtype), weights)    # (B*F, B*D)
    bias_tile = jnp.tile(biases, batch_size).reshape((1, batch_size * d))  # (1, B*D)

    vmem_spec = pl.BlockSpec(memory_space=pltpu.MemorySpace.VMEM)
    out_wide = pl.pallas_call(
        _tgcn_kernel,
        out_shape=jax.ShapeDtypeStruct((num_nodes, batch_size * d), jnp.float32),
        in_specs=[vmem_spec, vmem_spec, vmem_spec, vmem_spec],
        out_specs=vmem_spec,
    )(laplacian, x_nm, w_bd, bias_tile)

    # (N, B*D) -> (B, N, D) -> (B, N*D); tiny, free-ish XLA transpose/reshape.
    out = out_wide.reshape((num_nodes, batch_size, d)).transpose(1, 0, 2)
    return out.reshape((batch_size, num_nodes * d))


if __name__ == "__main__":
    # Small, deterministic shapes consistent with the module: inputs carry
    # C = 2 features per node (weights has num_gru_units + 2 rows).
    batch_size = 2
    num_nodes = 16
    num_gru_units = 32
    c = 2
    output_dim = 8

    key = jax.random.PRNGKey(0)
    k_adj, k_in, k_hid, k_w = jax.random.split(key, 4)

    # Deterministic symmetric adjacency with non-negative entries.
    a = jax.random.uniform(k_adj, (num_nodes, num_nodes), dtype=jnp.float32)
    adj = (a + a.T) * 0.5
    laplacian = calculate_laplacian_with_self_loop(adj)

    inputs = jax.random.normal(k_in, (batch_size, num_nodes, c), dtype=jnp.float32)
    hidden_state = jax.random.normal(
        k_hid, (batch_size, num_nodes * num_gru_units), dtype=jnp.float32
    )

    # Xavier-uniform weights (deterministic), constant-0 biases.
    fan_in, fan_out = num_gru_units + c, output_dim
    bound = jnp.sqrt(6.0 / (fan_in + fan_out))
    weights = jax.random.uniform(
        k_w, (fan_in, fan_out), dtype=jnp.float32, minval=-bound, maxval=bound
    )
    biases = jnp.zeros((output_dim,), dtype=jnp.float32)

    out = tgcn_graph_convolution(
        inputs, hidden_state, laplacian, weights, biases,
        num_gru_units, output_dim,
    )
    out = jax.block_until_ready(out)

    # Reference check against plain-JAX reproduction of the PyTorch math
    # (original operation order: (lap @ concat) @ W + bias).
    hidden = hidden_state.reshape((batch_size, num_nodes, num_gru_units))
    concat = jnp.concatenate([inputs, hidden], axis=-1)
    ref = jnp.einsum("nm,bmf->bnf", laplacian, concat) @ weights + biases
    ref = ref.reshape((batch_size, num_nodes * output_dim))
    assert out.shape == (batch_size, num_nodes * output_dim)
    assert jnp.allclose(out, ref, atol=1e-4, rtol=1e-4)

    print("KERNEL_OK")
</pallas_src>

<mosaic_0001>
module attributes {stable_mosaic.version = 11 : i64} {
  func.func @_tgcn_kernel(%arg0: memref<16x16xf32, #tpu.memory_space<vmem>>, %arg1: memref<16x68xf32, #tpu.memory_space<vmem>>, %arg2: memref<68x16xf32, #tpu.memory_space<vmem>>, %arg3: memref<1x16xf32, #tpu.memory_space<vmem>>, %arg4: memref<16x16xf32, #tpu.memory_space<vmem>>) attributes {dimension_semantics = [], scalar_prefetch = 0 : i64, scratch_operands = 0 : i64, tpu.core_type = #tpu.core_type<tc>} {
    %c0 = arith.constant 0 : index
    %c0_0 = arith.constant 0 : index
    %0 = vector.load %arg1[%c0, %c0_0] : memref<16x68xf32, #tpu.memory_space<vmem>>, vector<16x68xf32>
    %c0_1 = arith.constant 0 : index
    %c0_2 = arith.constant 0 : index
    %1 = vector.load %arg2[%c0_1, %c0_2] : memref<68x16xf32, #tpu.memory_space<vmem>>, vector<68x16xf32>
    %cst = arith.constant dense<0.000000e+00> : vector<16x16xf32>
    %2 = tpu.matmul %0, %1, %cst {dimension_numbers = #tpu.dot_dimension_numbers<[1], [0], [0], [1], [0, 0, 1, 1], [], []>} : vector<16x68xf32>, vector<68x16xf32>, vector<16x16xf32> -> vector<16x16xf32>
    %c0_3 = arith.constant 0 : index
    %c0_4 = arith.constant 0 : index
    %3 = vector.load %arg0[%c0_3, %c0_4] : memref<16x16xf32, #tpu.memory_space<vmem>>, vector<16x16xf32>
    %cst_5 = arith.constant dense<0.000000e+00> : vector<16x16xf32>
    %4 = tpu.matmul %3, %2, %cst_5 {dimension_numbers = #tpu.dot_dimension_numbers<[1], [0], [0], [1], [0, 0, 1, 1], [], []>} : vector<16x16xf32>, vector<16x16xf32>, vector<16x16xf32> -> vector<16x16xf32>
    %c0_6 = arith.constant 0 : index
    %c0_7 = arith.constant 0 : index
    %5 = vector.load %arg3[%c0_6, %c0_7] : memref<1x16xf32, #tpu.memory_space<vmem>>, vector<1x16xf32>
    %6 = vector.broadcast %5 : vector<1x16xf32> to vector<16x16xf32>
    %7 = arith.addf %4, %6 : vector<16x16xf32>
    %c0_8 = arith.constant 0 : index
    %c0_9 = arith.constant 0 : index
    %8 = vector.load %arg4[%c0_8, %c0_9] : memref<16x16xf32, #tpu.memory_space<vmem>>, vector<16x16xf32>
    tpu.vector_store %arg4[%c0_8, %c0_9], %7 {strides = array<i32>} : memref<16x16xf32, #tpu.memory_space<vmem>>, vector<16x16xf32>,
    return
  }
}

</mosaic_0001>

<bundles_post_ra>
// kernel: tpu_custom_call.1
= control target key start
LH: loop header
LB: loop body
LE: loop exit
PB: predicated region body
PF: predicated region fallthrough
CT: control target
= control target key end

     0   :  { %vm29_vm0 = vcmask 556032   ;;  %s408_s0 = inlined_call_operand.vmem [shape: f32[16,16], index: 0, kind: input, shape index: {}]   ;;  %s409_s1 = inlined_call_operand.vmem [shape: f32[16,68], index: 1, kind: input, shape index: {}]   ;;  %s410_s2 = inlined_call_operand.vmem [shape: f32[68,16], index: 2, kind: input, shape index: {}]   ;;  %s411_s3 = inlined_call_operand.vmem [shape: f32[1,16], index: 3, kind: input, shape index: {}]   ;;  %s412_s4 = inlined_call_operand.hbm [shape: f32[16,16], index: 4, kind: output, shape index: {}]  }
   0x1   :  { %v20_v0 = vld [vmem:[%s410_s2] sm:$0xff]  ;;  %v21_v1 = vld [vmem:[%s410_s2 + $0x8] sm:$0xff]  ;;  %v22_v2 = vld [vmem:[%s410_s2 + $0x10] sm:$0xff] }
   0x2   :  { %v273_v3 = vpack.c.bf16 %v21_v1, %v20_v0  ;;  %v23_v4 = vld [vmem:[%s410_s2 + $0x18] sm:$0xff]  ;;  %v24_v6 = vld [vmem:[%s410_s2 + $0x20] sm:$0xff]  ;;  %v25_v7 = vld [vmem:[%s410_s2 + $0x28] sm:$0xff] }
   0x3   :  { %v277_v5 = vpack.c.bf16 %v23_v4, %v22_v2  ;;  %v18_v8 = vld [vmem:[%s409_s1] sm:$0xff] }
   0x4   :  { %274 = vmatprep.subr.bf16.mxu0 %v273_v3 }
   0x5   :  { %9 = vsyncpa [#allocation3], 0  ;;  %276 = vmatpush3.bf16.msra.mxu0 %v273_v3  ;;  %263 = vmatprep.mubr.msk.f32.mxu0 %vm29_vm0, %v18_v8  ;;  %v281_v9 = vpack.c.bf16 %v25_v7, %v24_v6  ;;  %v26_v10 = vld [vmem:[%s410_s2 + $0x30] sm:$0xff]  ;;  %v27_v11 = vld [vmem:[%s410_s2 + $0x38] sm:$0xff]  ;;  %vm36_vm1 = vcmask 1043456   ;;  %vm124_vm2 = vcmask 130048  }
   0x6   :  { %278 = vmatprep.subr.bf16.mxu0 %v277_v5  ;;  %v285_v12 = vpack.c.bf16 %v27_v11, %v26_v10  ;;  %v28_v13 = vld [vmem:[%s410_s2 + $0x40] sm:$0xf]  ;;  %v19_v14 = vld [vmem:[%s409_s1 + $0x8] sm:$0xff]  ;;  %s320_s15 = smov [#allocation2]  }
   0x7   :  { %v115_v15 = vld [vmem:[%s408_s0] sm:$0xff]  ;;  %v116_v19 = vld [vmem:[%s408_s0 + $0x8] sm:$0xff]  ;;  %s213_s16 = sshll.u32 %s320_s15, 4  ;;  %s214_s16 = int_to_ptr.vmem [resolvable:$true] %s213_s16 }
   0x8   :  { %270 = vmatprep.mubr.msk.f32.mxu1 %vm124_vm2, %v115_v15  ;;  %v227_v20 = vld [vmem:[%s411_s3] ss:$0 sm:$0xff]  ;;  %s296_s17 = scalar_lea.vmem %s214_s16, 256  ;;  %p301_p1 = scmp.lt.s32.totalorder %s214_s16, %s214_s16 }
   0x9   :  { %280 = vmatpush3.bf16.msra.mxu0 %v277_v5  ;;  %p297_p0 = scmp.ne.s32.totalorder %s214_s16, %s296_s17  ;;  %p302_p2 = scmp.lt.s32.totalorder %s296_s17, %s296_s17 }
   0xa   :  { %282 = vmatprep.subr.bf16.mxu0 %v281_v9 }
   0xb   :  { %p303_p3 = por %p302_p2, %p301_p1 }
   0xd   :  { %284 = vmatpush3.bf16.msra.mxu0 %v281_v9  ;;  %p304_p4 = pnand %p303_p3, %p297_p0 }
   0xe   :  { %286 = vmatprep.subr.bf16.mxu0 %v285_v12 }
  0x11   :  { %288 = vmatpush3.bf16.msra.mxu0 %v285_v12 }
  0x12   :  { %261 = vmatprep.subr.msk.mxu0 %vm36_vm1, %v28_v13 }
  0x15   :  { %262 = vmatpush3.msk.msra.mxu0 %vm36_vm1, %v28_v13 }
  0x16   :  { %264 = vmatmul.mubr.msk.f32.vlgmr.msra.gmra.mrb[0].mxu0 %vm29_vm0, %v19_v14 }
  0xe9   :  { %v265_v16 = vpop.f32.mrb[0].mxu0 }
  0xea   :  { %v106_v17 = vpop.f32.mrb[1].mxu0 }
  0xeb   :  { %v289_v18 = vpack.c.bf16 %v265_v16, %v106_v17 }
  0xed   :  { %290 = vmatprep.subr.bf16.mxu1 %v289_v18 }
  0xee   :  { %292 = vmatpush3.bf16.msra.mxu1 %v289_v18 }
  0xf1   :  { %271 = vmatmul.mubr.msk.f32.vlgmr.msra.gmra.mrb[0].mxu1 %vm124_vm2, %v116_v19 }
 0x1c4   :  { %v272_v21 = vpop.f32.mrb[0].mxu1 }
 0x1c5   :  { %v203_v22 = vadd.f32 %v272_v21, %v227_v20  ;;  %v197_v23 = vpop.f32.mrb[1].mxu1 }
 0x1c6   :  { %v198_v24 = vadd.f32 %v227_v20, %v197_v23 }
 0x1c7   :  { %207 = vst.msk [vmem:[#allocation2 + $0x8] sm:$0xff] %vm124_vm2, %v203_v22 }
 0x1c8   :  { %206 = vst.msk [vmem:[#allocation2] sm:$0xff] %vm124_vm2, %v198_v24 }
 0x1c9   :  { %307 = shalt.err (!%p304_p4)
}
 0x1ca   :  { %s308_s18 = scalar_lea.hbm %s412_s4, 256 }
 0x1cb   :  { %p309_p5 = scmp.ne.s32.totalorder %s412_s4, %s308_s18  ;;  %p312_p6 = scmp.lt.u32.totalorder %s308_s18, %s412_s4 }
 0x1cd   :  { %p314_p7 = pnand %p312_p6, %p309_p5 }
 0x1cf   :  { %317 = shalt.err (!%p314_p7)
}
 0x1d0   :  { %s321_s23 = smov 128   ;;  %s322_s24 = smov 8  }
 0x1d1   :  { %219 = dma.vmem_to_hbm [thread:$0]  %s214_s16, 256, %s412_s4, [#allocation3], %s321_s23, %s321_s23, %s322_s24  }
 0x1d2   :  { %318 = dma.done.wait [#allocation3], 256  }
 0x1d3   :  { %319 = vsyncadd [#allocation3], 4294967040 }
 0x1d4   :  { %223 = vsyncpa [#allocation3], 1 }

</bundles_post_ra>
